<compile_context>
chip_gen: v5e
topology: v5e:2x2
jax: 0.10.0
libtpu: 0.0.40
codegen_flags: <defaults>
</compile_context>

<pallas_src>
import functools

import jax
import jax.numpy as jnp
from jax.experimental import pallas as pl
from jax.experimental.pallas import tpu as pltpu


def _wsconv2d_kernel(xp_ref, w_ref, b_ref, o_ref, col_ref, *,
                     kh_size, kw_size, wp, m_pad, b_blk):
    """Processes b_blk images per grid step.

    xp_ref : (b_blk, Cin, L_in)      flat, zero-padded input (VMEM, input dtype)
    w_ref  : (Cout, K=KH*KW*Cin)     scale-folded flattened weight (compute dtype)
    b_ref  : (Cout, 1)               bias (f32)
    o_ref  : (b_blk, Cout, m_pad)    strided-column output tile (lane-dense store)
    col_ref: (K, b_blk*m_pad)        im2col scratch in (K, M) layout (compute dtype)
    """
    cin = xp_ref.shape[1]

    # Stage 1: im2col.  Each tap is a single contiguous lane slice of the flat input
    # at a static offset (lane rotate on the XLU), stored lane-dense (width m_pad,
    # a multiple of 128) into the (K, M) scratch -> no masked vst, no relayout copies.
    for b in range(b_blk):
        for kh in range(kh_size):
            for kw in range(kw_size):
                tap = kh * kw_size + kw
                off = kh * wp + kw
                col_ref[tap * cin:(tap + 1) * cin,
                        b * m_pad:(b + 1) * m_pad] = (
                    xp_ref[b, :, off:off + m_pad].astype(col_ref.dtype))

    # Stage 2: one MXU matmul (Cout,K)@(K, b_blk*m_pad) with f32 accumulation,
    # f32 lane-broadcast bias add, then unmasked lane-dense stores per image.
    acc = jnp.dot(w_ref[...], col_ref[...], preferred_element_type=jnp.float32)
    acc = acc + b_ref[...]                          # (Cout, 1) broadcast, f32
    for b in range(b_blk):
        o_ref[b] = acc[:, b * m_pad:(b + 1) * m_pad].astype(o_ref.dtype)


def wsconv2d(x_nchw, weight_oihw, bias, *, stride=1, padding=1, gain=2,
             compute_dtype=jnp.bfloat16, batch_block=None):
    """WSConv2d forward.  x_nchw: (N, Cin, H, W) -> (N, Cout, H', W')."""
    assert stride == 1, "module default stride=1 only"  # TODO(synk): strided variant
    N, Cin, H, W = x_nchw.shape
    Cout, Cin_w, KH, KW = weight_oihw.shape
    assert Cin_w == Cin

    scale = float((gain / (Cin * KH * KW)) ** 0.5)
    Hp, Wp = H + 2 * padding, W + 2 * padding
    out_h = Hp - KH + 1
    out_w = Wp - KW + 1
    K = KH * KW * Cin

    # Strided-column layout: column j <-> (oh, ow) = (j // Wp, j % Wp); columns with
    # ow >= out_w are junk and get sliced off in the wrapper.  Pad M to a multiple of
    # 128 so every kernel store is lane-dense / unmasked.
    m_raw = out_h * Wp
    m_pad = ((m_raw + 127) // 128) * 128
    # Flat-input length so every tap slice [off, off + m_pad) stays in bounds.
    l_in = (KH - 1) * Wp + (KW - 1) + m_pad

    in_itemsize = jnp.dtype(x_nchw.dtype).itemsize
    col_itemsize = jnp.dtype(compute_dtype).itemsize

    # Per-image working set (double-buffered in/out blocks + col scratch); pick the
    # batch block so it stays well under the v7x 64 MiB-per-TC VMEM budget.
    per_b = (2 * Cin * l_in * in_itemsize
             + 2 * Cout * m_pad * in_itemsize
             + K * m_pad * col_itemsize)
    if batch_block is None:
        batch_block = int(max(1, min(N, 8, (8 << 20) // per_b)))
    b_blk = int(batch_block)
    n_pad = ((N + b_blk - 1) // b_blk) * b_blk

    # Layout glue in plain JAX (tiny vs. the conv): zero-pad batch + spatial, flatten
    # the padded spatial dims, and pad the flat axis so tap slices never run OOB.
    xp = jnp.pad(x_nchw, ((0, n_pad - N), (0, 0),
                          (padding, padding), (padding, padding)))
    xp_flat = jnp.pad(xp.reshape(n_pad, Cin, Hp * Wp),
                      ((0, 0), (0, 0), (0, l_in - Hp * Wp)))

    # Fold the WS scale into the (tiny) weight; flatten OIHW -> (Cout, KH*KW*Cin) in
    # (kh, kw, cin) order to match the im2col row order.
    w2d = (jnp.transpose(weight_oihw, (0, 2, 3, 1)).reshape(Cout, K)
           * scale).astype(compute_dtype)
    b2d = bias.reshape(Cout, 1).astype(jnp.float32)

    kernel = functools.partial(_wsconv2d_kernel, kh_size=KH, kw_size=KW, wp=Wp,
                               m_pad=m_pad, b_blk=b_blk)

    flops = 2 * n_pad * m_pad * K * Cout
    bytes_accessed = (n_pad * Cin * l_in * in_itemsize
                      + Cout * K * col_itemsize + Cout * 4
                      + n_pad * Cout * m_pad * in_itemsize)

    # Derive the VMEM limit from actual buffer sizes (plus headroom) instead of a
    # flat 48 MiB; clamp well under v7x's 64 MiB per-TC VMEM.
    vmem_bytes = b_blk * per_b + Cout * K * col_itemsize + Cout * 4
    vmem_limit = int(min(max(2 * vmem_bytes + (4 << 20), 16 << 20), 48 << 20))

    out_flat = pl.pallas_call(
        kernel,
        out_shape=jax.ShapeDtypeStruct((n_pad, Cout, m_pad), x_nchw.dtype),
        grid=(n_pad // b_blk,),
        in_specs=[
            pl.BlockSpec((b_blk, Cin, l_in), lambda n: (n, 0, 0)),
            pl.BlockSpec((Cout, K), lambda n: (0, 0)),
            pl.BlockSpec((Cout, 1), lambda n: (0, 0)),
        ],
        out_specs=pl.BlockSpec((b_blk, Cout, m_pad), lambda n: (n, 0, 0)),
        scratch_shapes=[pltpu.VMEM((K, b_blk * m_pad), compute_dtype)],
        compiler_params=pltpu.CompilerParams(
            dimension_semantics=("parallel",),   # batch blocks shard across v7x's 2 TCs
            vmem_limit_bytes=vmem_limit),
        cost_estimate=pl.CostEstimate(flops=flops, transcendentals=0,
                                      bytes_accessed=bytes_accessed),
    )(xp_flat, w2d, b2d)

    # Drop batch padding, lane padding, and junk strided columns; reshape to NCHW.
    out = out_flat[:N, :, :m_raw].reshape(N, Cout, out_h, Wp)[..., :out_w]
    return out


if __name__ == "__main__":
    key = jax.random.PRNGKey(0)
    k_x, k_w = jax.random.split(key)

    N, Cin, H, W = 2, 4, 16, 16
    Cout, KS = 8, 3

    x = jax.random.normal(k_x, (N, Cin, H, W), dtype=jnp.float32)
    # nn.init.normal_(conv.weight): standard normal; nn.init.zeros_(bias).
    weight = jax.random.normal(k_w, (Cout, Cin, KS, KS), dtype=jnp.float32)
    bias = jnp.zeros((Cout,), dtype=jnp.float32)

    # Reference: XLA's native conv with the same WSConv2d semantics.
    scale = (2.0 / (Cin * KS * KS)) ** 0.5
    ref = jax.lax.conv_general_dilated(
        x * scale, weight, window_strides=(1, 1), padding=((1, 1), (1, 1)),
        dimension_numbers=("NCHW", "OIHW", "NCHW"),
    ) + bias.reshape(1, Cout, 1, 1)

    # Default path: bf16 MXU inputs, f32 accumulation (loose tolerance for the cast).
    out_bf16 = jax.block_until_ready(wsconv2d(x, weight, bias))
    assert out_bf16.shape == (N, Cout, H, W)
    err_bf16 = float(jnp.max(jnp.abs(out_bf16 - ref)))
    assert jnp.allclose(out_bf16, ref, atol=6e-2, rtol=6e-2), err_bf16

    # Full-precision compute path.
    out_f32 = jax.block_until_ready(
        wsconv2d(x, weight, bias, compute_dtype=jnp.float32))
    err_f32 = float(jnp.max(jnp.abs(out_f32 - ref)))
    assert jnp.allclose(out_f32, ref, atol=2e-2, rtol=2e-2), err_f32

    print("KERNEL_OK")
</pallas_src>

<mosaic_0001>
module attributes {stable_mosaic.version = 11 : i64} {
  func.func @_wsconv2d_kernel(%arg0: i32, %arg1: memref<2x4x422xf32, #tpu.memory_space<vmem>>, %arg2: memref<8x36xbf16, #tpu.memory_space<vmem>>, %arg3: memref<8x1xf32, #tpu.memory_space<vmem>>, %arg4: memref<2x8x384xf32, #tpu.memory_space<vmem>>, %arg5: memref<36x768xbf16, #tpu.memory_space<vmem>>) attributes {dimension_semantics = [#tpu.dimension_semantics<parallel>], iteration_bounds = array<i64: 1>, scalar_prefetch = 0 : i64, scratch_operands = 1 : i64, tpu.core_type = #tpu.core_type<tc>, window_params = [{transform_indices = @transform_0, window_bounds = array<i64: 2, 4, 422>}, {pipeline_mode = #tpu.pipeline_mode<synchronous>, transform_indices = @transform_1, window_bounds = array<i64: 8, 36>}, {pipeline_mode = #tpu.pipeline_mode<synchronous>, transform_indices = @transform_2, window_bounds = array<i64: 8, 1>}, {transform_indices = @transform_3, window_bounds = array<i64: 2, 8, 384>}]} {
    %c0 = arith.constant 0 : index
    %c0_0 = arith.constant 0 : index
    %c0_1 = arith.constant 0 : index
    %0 = vector.load %arg1[%c0, %c0_0, %c0_1] : memref<2x4x422xf32, #tpu.memory_space<vmem>>, vector<1x4x384xf32>
    %1 = vector.shape_cast %0 : vector<1x4x384xf32> to vector<4x384xf32>
    %2 = arith.truncf %1 : vector<4x384xf32> to vector<4x384xbf16>
    %c0_2 = arith.constant 0 : index
    %c0_3 = arith.constant 0 : index
    %3 = vector.load %arg5[%c0_2, %c0_3] : memref<36x768xbf16, #tpu.memory_space<vmem>>, vector<4x384xbf16>
    tpu.vector_store %arg5[%c0_2, %c0_3], %2 {strides = array<i32>} : memref<36x768xbf16, #tpu.memory_space<vmem>>, vector<4x384xbf16>,
    %c0_4 = arith.constant 0 : index
    %c0_5 = arith.constant 0 : index
    %c1 = arith.constant 1 : index
    %4 = vector.load %arg1[%c0_4, %c0_5, %c1] : memref<2x4x422xf32, #tpu.memory_space<vmem>>, vector<1x4x384xf32>
    %5 = vector.shape_cast %4 : vector<1x4x384xf32> to vector<4x384xf32>
    %6 = arith.truncf %5 : vector<4x384xf32> to vector<4x384xbf16>
    %c4 = arith.constant 4 : index
    %c0_6 = arith.constant 0 : index
    %7 = vector.load %arg5[%c4, %c0_6] : memref<36x768xbf16, #tpu.memory_space<vmem>>, vector<4x384xbf16>
    tpu.vector_store %arg5[%c4, %c0_6], %6 {strides = array<i32>} : memref<36x768xbf16, #tpu.memory_space<vmem>>, vector<4x384xbf16>,
    %c0_7 = arith.constant 0 : index
    %c0_8 = arith.constant 0 : index
    %c2 = arith.constant 2 : index
    %8 = vector.load %arg1[%c0_7, %c0_8, %c2] : memref<2x4x422xf32, #tpu.memory_space<vmem>>, vector<1x4x384xf32>
    %9 = vector.shape_cast %8 : vector<1x4x384xf32> to vector<4x384xf32>
    %10 = arith.truncf %9 : vector<4x384xf32> to vector<4x384xbf16>
    %c8 = arith.constant 8 : index
    %c0_9 = arith.constant 0 : index
    %11 = vector.load %arg5[%c8, %c0_9] : memref<36x768xbf16, #tpu.memory_space<vmem>>, vector<4x384xbf16>
    tpu.vector_store %arg5[%c8, %c0_9], %10 {strides = array<i32>} : memref<36x768xbf16, #tpu.memory_space<vmem>>, vector<4x384xbf16>,
    %c0_10 = arith.constant 0 : index
    %c0_11 = arith.constant 0 : index
    %c18 = arith.constant 18 : index
    %12 = vector.load %arg1[%c0_10, %c0_11, %c18] : memref<2x4x422xf32, #tpu.memory_space<vmem>>, vector<1x4x384xf32>
    %13 = vector.shape_cast %12 : vector<1x4x384xf32> to vector<4x384xf32>
    %14 = arith.truncf %13 : vector<4x384xf32> to vector<4x384xbf16>
    %c12 = arith.constant 12 : index
    %c0_12 = arith.constant 0 : index
    %15 = vector.load %arg5[%c12, %c0_12] : memref<36x768xbf16, #tpu.memory_space<vmem>>, vector<4x384xbf16>
    tpu.vector_store %arg5[%c12, %c0_12], %14 {strides = array<i32>} : memref<36x768xbf16, #tpu.memory_space<vmem>>, vector<4x384xbf16>,
    %c0_13 = arith.constant 0 : index
    %c0_14 = arith.constant 0 : index
    %c19 = arith.constant 19 : index
    %16 = vector.load %arg1[%c0_13, %c0_14, %c19] : memref<2x4x422xf32, #tpu.memory_space<vmem>>, vector<1x4x384xf32>
    %17 = vector.shape_cast %16 : vector<1x4x384xf32> to vector<4x384xf32>
    %18 = arith.truncf %17 : vector<4x384xf32> to vector<4x384xbf16>
    %c16 = arith.constant 16 : index
    %c0_15 = arith.constant 0 : index
    %19 = vector.load %arg5[%c16, %c0_15] : memref<36x768xbf16, #tpu.memory_space<vmem>>, vector<4x384xbf16>
    tpu.vector_store %arg5[%c16, %c0_15], %18 {strides = array<i32>} : memref<36x768xbf16, #tpu.memory_space<vmem>>, vector<4x384xbf16>,
    %c0_16 = arith.constant 0 : index
    %c0_17 = arith.constant 0 : index
    %c20 = arith.constant 20 : index
    %20 = vector.load %arg1[%c0_16, %c0_17, %c20] : memref<2x4x422xf32, #tpu.memory_space<vmem>>, vector<1x4x384xf32>
    %21 = vector.shape_cast %20 : vector<1x4x384xf32> to vector<4x384xf32>
    %22 = arith.truncf %21 : vector<4x384xf32> to vector<4x384xbf16>
    %c20_18 = arith.constant 20 : index
    %c0_19 = arith.constant 0 : index
    %23 = vector.load %arg5[%c20_18, %c0_19] : memref<36x768xbf16, #tpu.memory_space<vmem>>, vector<4x384xbf16>
    tpu.vector_store %arg5[%c20_18, %c0_19], %22 {strides = array<i32>} : memref<36x768xbf16, #tpu.memory_space<vmem>>, vector<4x384xbf16>,
    %c0_20 = arith.constant 0 : index
    %c0_21 = arith.constant 0 : index
    %c36 = arith.constant 36 : index
    %24 = vector.load %arg1[%c0_20, %c0_21, %c36] : memref<2x4x422xf32, #tpu.memory_space<vmem>>, vector<1x4x384xf32>
    %25 = vector.shape_cast %24 : vector<1x4x384xf32> to vector<4x384xf32>
    %26 = arith.truncf %25 : vector<4x384xf32> to vector<4x384xbf16>
    %c24 = arith.constant 24 : index
    %c0_22 = arith.constant 0 : index
    %27 = vector.load %arg5[%c24, %c0_22] : memref<36x768xbf16, #tpu.memory_space<vmem>>, vector<4x384xbf16>
    tpu.vector_store %arg5[%c24, %c0_22], %26 {strides = array<i32>} : memref<36x768xbf16, #tpu.memory_space<vmem>>, vector<4x384xbf16>,
    %c0_23 = arith.constant 0 : index
    %c0_24 = arith.constant 0 : index
    %c37 = arith.constant 37 : index
    %28 = vector.load %arg1[%c0_23, %c0_24, %c37] : memref<2x4x422xf32, #tpu.memory_space<vmem>>, vector<1x4x384xf32>
    %29 = vector.shape_cast %28 : vector<1x4x384xf32> to vector<4x384xf32>
    %30 = arith.truncf %29 : vector<4x384xf32> to vector<4x384xbf16>
    %c28 = arith.constant 28 : index
    %c0_25 = arith.constant 0 : index
    %31 = vector.load %arg5[%c28, %c0_25] : memref<36x768xbf16, #tpu.memory_space<vmem>>, vector<4x384xbf16>
    tpu.vector_store %arg5[%c28, %c0_25], %30 {strides = array<i32>} : memref<36x768xbf16, #tpu.memory_space<vmem>>, vector<4x384xbf16>,
    %c0_26 = arith.constant 0 : index
    %c0_27 = arith.constant 0 : index
    %c38 = arith.constant 38 : index
    %32 = vector.load %arg1[%c0_26, %c0_27, %c38] : memref<2x4x422xf32, #tpu.memory_space<vmem>>, vector<1x4x384xf32>
    %33 = vector.shape_cast %32 : vector<1x4x384xf32> to vector<4x384xf32>
    %34 = arith.truncf %33 : vector<4x384xf32> to vector<4x384xbf16>
    %c32 = arith.constant 32 : index
    %c0_28 = arith.constant 0 : index
    %35 = vector.load %arg5[%c32, %c0_28] : memref<36x768xbf16, #tpu.memory_space<vmem>>, vector<4x384xbf16>
    tpu.vector_store %arg5[%c32, %c0_28], %34 {strides = array<i32>} : memref<36x768xbf16, #tpu.memory_space<vmem>>, vector<4x384xbf16>,
    %c1_29 = arith.constant 1 : index
    %c0_30 = arith.constant 0 : index
    %c0_31 = arith.constant 0 : index
    %36 = vector.load %arg1[%c1_29, %c0_30, %c0_31] : memref<2x4x422xf32, #tpu.memory_space<vmem>>, vector<1x4x384xf32>
    %37 = vector.shape_cast %36 : vector<1x4x384xf32> to vector<4x384xf32>
    %38 = arith.truncf %37 : vector<4x384xf32> to vector<4x384xbf16>
    %c0_32 = arith.constant 0 : index
    %c384 = arith.constant 384 : index
    %39 = vector.load %arg5[%c0_32, %c384] : memref<36x768xbf16, #tpu.memory_space<vmem>>, vector<4x384xbf16>
    tpu.vector_store %arg5[%c0_32, %c384], %38 {strides = array<i32>} : memref<36x768xbf16, #tpu.memory_space<vmem>>, vector<4x384xbf16>,
    %c1_33 = arith.constant 1 : index
    %c0_34 = arith.constant 0 : index
    %c1_35 = arith.constant 1 : index
    %40 = vector.load %arg1[%c1_33, %c0_34, %c1_35] : memref<2x4x422xf32, #tpu.memory_space<vmem>>, vector<1x4x384xf32>
    %41 = vector.shape_cast %40 : vector<1x4x384xf32> to vector<4x384xf32>
    %42 = arith.truncf %41 : vector<4x384xf32> to vector<4x384xbf16>
    %c4_36 = arith.constant 4 : index
    %c384_37 = arith.constant 384 : index
    %43 = vector.load %arg5[%c4_36, %c384_37] : memref<36x768xbf16, #tpu.memory_space<vmem>>, vector<4x384xbf16>
    tpu.vector_store %arg5[%c4_36, %c384_37], %42 {strides = array<i32>} : memref<36x768xbf16, #tpu.memory_space<vmem>>, vector<4x384xbf16>,
    %c1_38 = arith.constant 1 : index
    %c0_39 = arith.constant 0 : index
    %c2_40 = arith.constant 2 : index
    %44 = vector.load %arg1[%c1_38, %c0_39, %c2_40] : memref<2x4x422xf32, #tpu.memory_space<vmem>>, vector<1x4x384xf32>
    %45 = vector.shape_cast %44 : vector<1x4x384xf32> to vector<4x384xf32>
    %46 = arith.truncf %45 : vector<4x384xf32> to vector<4x384xbf16>
    %c8_41 = arith.constant 8 : index
    %c384_42 = arith.constant 384 : index
    %47 = vector.load %arg5[%c8_41, %c384_42] : memref<36x768xbf16, #tpu.memory_space<vmem>>, vector<4x384xbf16>
    tpu.vector_store %arg5[%c8_41, %c384_42], %46 {strides = array<i32>} : memref<36x768xbf16, #tpu.memory_space<vmem>>, vector<4x384xbf16>,
    %c1_43 = arith.constant 1 : index
    %c0_44 = arith.constant 0 : index
    %c18_45 = arith.constant 18 : index
    %48 = vector.load %arg1[%c1_43, %c0_44, %c18_45] : memref<2x4x422xf32, #tpu.memory_space<vmem>>, vector<1x4x384xf32>
    %49 = vector.shape_cast %48 : vector<1x4x384xf32> to vector<4x384xf32>
    %50 = arith.truncf %49 : vector<4x384xf32> to vector<4x384xbf16>
    %c12_46 = arith.constant 12 : index
    %c384_47 = arith.constant 384 : index
    %51 = vector.load %arg5[%c12_46, %c384_47] : memref<36x768xbf16, #tpu.memory_space<vmem>>, vector<4x384xbf16>
    tpu.vector_store %arg5[%c12_46, %c384_47], %50 {strides = array<i32>} : memref<36x768xbf16, #tpu.memory_space<vmem>>, vector<4x384xbf16>,
    %c1_48 = arith.constant 1 : index
    %c0_49 = arith.constant 0 : index
    %c19_50 = arith.constant 19 : index
    %52 = vector.load %arg1[%c1_48, %c0_49, %c19_50] : memref<2x4x422xf32, #tpu.memory_space<vmem>>, vector<1x4x384xf32>
    %53 = vector.shape_cast %52 : vector<1x4x384xf32> to vector<4x384xf32>
    %54 = arith.truncf %53 : vector<4x384xf32> to vector<4x384xbf16>
    %c16_51 = arith.constant 16 : index
    %c384_52 = arith.constant 384 : index
    %55 = vector.load %arg5[%c16_51, %c384_52] : memref<36x768xbf16, #tpu.memory_space<vmem>>, vector<4x384xbf16>
    tpu.vector_store %arg5[%c16_51, %c384_52], %54 {strides = array<i32>} : memref<36x768xbf16, #tpu.memory_space<vmem>>, vector<4x384xbf16>,
    %c1_53 = arith.constant 1 : index
    %c0_54 = arith.constant 0 : index
    %c20_55 = arith.constant 20 : index
    %56 = vector.load %arg1[%c1_53, %c0_54, %c20_55] : memref<2x4x422xf32, #tpu.memory_space<vmem>>, vector<1x4x384xf32>
    %57 = vector.shape_cast %56 : vector<1x4x384xf32> to vector<4x384xf32>
    %58 = arith.truncf %57 : vector<4x384xf32> to vector<4x384xbf16>
    %c20_56 = arith.constant 20 : index
    %c384_57 = arith.constant 384 : index
    %59 = vector.load %arg5[%c20_56, %c384_57] : memref<36x768xbf16, #tpu.memory_space<vmem>>, vector<4x384xbf16>
    tpu.vector_store %arg5[%c20_56, %c384_57], %58 {strides = array<i32>} : memref<36x768xbf16, #tpu.memory_space<vmem>>, vector<4x384xbf16>,
    %c1_58 = arith.constant 1 : index
    %c0_59 = arith.constant 0 : index
    %c36_60 = arith.constant 36 : index
    %60 = vector.load %arg1[%c1_58, %c0_59, %c36_60] : memref<2x4x422xf32, #tpu.memory_space<vmem>>, vector<1x4x384xf32>
    %61 = vector.shape_cast %60 : vector<1x4x384xf32> to vector<4x384xf32>
    %62 = arith.truncf %61 : vector<4x384xf32> to vector<4x384xbf16>
    %c24_61 = arith.constant 24 : index
    %c384_62 = arith.constant 384 : index
    %63 = vector.load %arg5[%c24_61, %c384_62] : memref<36x768xbf16, #tpu.memory_space<vmem>>, vector<4x384xbf16>
    tpu.vector_store %arg5[%c24_61, %c384_62], %62 {strides = array<i32>} : memref<36x768xbf16, #tpu.memory_space<vmem>>, vector<4x384xbf16>,
    %c1_63 = arith.constant 1 : index
    %c0_64 = arith.constant 0 : index
    %c37_65 = arith.constant 37 : index
    %64 = vector.load %arg1[%c1_63, %c0_64, %c37_65] : memref<2x4x422xf32, #tpu.memory_space<vmem>>, vector<1x4x384xf32>
    %65 = vector.shape_cast %64 : vector<1x4x384xf32> to vector<4x384xf32>
    %66 = arith.truncf %65 : vector<4x384xf32> to vector<4x384xbf16>
    %c28_66 = arith.constant 28 : index
    %c384_67 = arith.constant 384 : index
    %67 = vector.load %arg5[%c28_66, %c384_67] : memref<36x768xbf16, #tpu.memory_space<vmem>>, vector<4x384xbf16>
    tpu.vector_store %arg5[%c28_66, %c384_67], %66 {strides = array<i32>} : memref<36x768xbf16, #tpu.memory_space<vmem>>, vector<4x384xbf16>,
    %c1_68 = arith.constant 1 : index
    %c0_69 = arith.constant 0 : index
    %c38_70 = arith.constant 38 : index
    %68 = vector.load %arg1[%c1_68, %c0_69, %c38_70] : memref<2x4x422xf32, #tpu.memory_space<vmem>>, vector<1x4x384xf32>
    %69 = vector.shape_cast %68 : vector<1x4x384xf32> to vector<4x384xf32>
    %70 = arith.truncf %69 : vector<4x384xf32> to vector<4x384xbf16>
    %c32_71 = arith.constant 32 : index
    %c384_72 = arith.constant 384 : index
    %71 = vector.load %arg5[%c32_71, %c384_72] : memref<36x768xbf16, #tpu.memory_space<vmem>>, vector<4x384xbf16>
    tpu.vector_store %arg5[%c32_71, %c384_72], %70 {strides = array<i32>} : memref<36x768xbf16, #tpu.memory_space<vmem>>, vector<4x384xbf16>,
    %c0_73 = arith.constant 0 : index
    %c0_74 = arith.constant 0 : index
    %72 = vector.load %arg2[%c0_73, %c0_74] : memref<8x36xbf16, #tpu.memory_space<vmem>>, vector<8x36xbf16>
    %c0_75 = arith.constant 0 : index
    %c0_76 = arith.constant 0 : index
    %73 = vector.load %arg5[%c0_75, %c0_76] : memref<36x768xbf16, #tpu.memory_space<vmem>>, vector<36x768xbf16>
    %cst = arith.constant dense<0.000000e+00> : vector<8x768xf32>
    %74 = tpu.matmul %72, %73, %cst {dimension_numbers = #tpu.dot_dimension_numbers<[1], [0], [0], [1], [0, 0, 1, 1], [], []>} : vector<8x36xbf16>, vector<36x768xbf16>, vector<8x768xf32> -> vector<8x768xf32>
    %c0_77 = arith.constant 0 : index
    %c0_78 = arith.constant 0 : index
    %75 = vector.load %arg3[%c0_77, %c0_78] : memref<8x1xf32, #tpu.memory_space<vmem>>, vector<8x1xf32>
    %76 = vector.broadcast %75 : vector<8x1xf32> to vector<8x768xf32>
    %77 = arith.addf %74, %76 : vector<8x768xf32>
    %78 = vector.extract_strided_slice %77 {offsets = [0, 0], sizes = [8, 384], strides = [1, 1]} : vector<8x768xf32> to vector<8x384xf32>
    %c0_79 = arith.constant 0 : index
    %c0_80 = arith.constant 0 : index
    %c0_81 = arith.constant 0 : index
    %79 = vector.load %arg4[%c0_79, %c0_80, %c0_81] : memref<2x8x384xf32, #tpu.memory_space<vmem>>, vector<1x8x384xf32>
    %80 = vector.shape_cast %79 : vector<1x8x384xf32> to vector<8x384xf32>
    %81 = vector.shape_cast %78 : vector<8x384xf32> to vector<1x8x384xf32>
    tpu.vector_store %arg4[%c0_79, %c0_80, %c0_81], %81 {strides = array<i32>} : memref<2x8x384xf32, #tpu.memory_space<vmem>>, vector<1x8x384xf32>,
    %82 = vector.extract_strided_slice %77 {offsets = [0, 384], sizes = [8, 384], strides = [1, 1]} : vector<8x768xf32> to vector<8x384xf32>
    %c1_82 = arith.constant 1 : index
    %c0_83 = arith.constant 0 : index
    %c0_84 = arith.constant 0 : index
    %83 = vector.load %arg4[%c1_82, %c0_83, %c0_84] : memref<2x8x384xf32, #tpu.memory_space<vmem>>, vector<1x8x384xf32>
    %84 = vector.shape_cast %83 : vector<1x8x384xf32> to vector<8x384xf32>
    %85 = vector.shape_cast %82 : vector<8x384xf32> to vector<1x8x384xf32>
    tpu.vector_store %arg4[%c1_82, %c0_83, %c0_84], %85 {strides = array<i32>} : memref<2x8x384xf32, #tpu.memory_space<vmem>>, vector<1x8x384xf32>,
    return
  }
  func.func @transform_0(%arg0: i32) -> (i32, i32, i32) {
    %c0_i32 = arith.constant 0 : i32
    %c0_i32_0 = arith.constant 0 : i32
    %c0_i32_1 = arith.constant 0 : i32
    return %arg0, %c0_i32, %c0_i32_0 : i32, i32, i32
  }
  func.func @transform_1(%arg0: i32) -> (i32, i32) {
    %c0_i32 = arith.constant 0 : i32
    %c0_i32_0 = arith.constant 0 : i32
    %c0_i32_1 = arith.constant 0 : i32
    return %c0_i32, %c0_i32_0 : i32, i32
  }
  func.func @transform_2(%arg0: i32) -> (i32, i32) {
    %c0_i32 = arith.constant 0 : i32
    %c0_i32_0 = arith.constant 0 : i32
    %c0_i32_1 = arith.constant 0 : i32
    return %c0_i32, %c0_i32_0 : i32, i32
  }
  func.func @transform_3(%arg0: i32) -> (i32, i32, i32) {
    %c0_i32 = arith.constant 0 : i32
    %c0_i32_0 = arith.constant 0 : i32
    %c0_i32_1 = arith.constant 0 : i32
    return %arg0, %c0_i32, %c0_i32_0 : i32, i32, i32
  }
}

</mosaic_0001>

<bundles_post_ra>
// kernel: tpu_custom_call.1
= control target key start
LH: loop header
LB: loop body
LE: loop exit
PB: predicated region body
PF: predicated region fallthrough
CT: control target
= control target key end

     0   :  { %8 = vsyncpa [#allocation4], 0  ;;  %s1208_s0 = inlined_call_operand.hbm [shape: f32[2,4,422], index: 0, kind: input, shape index: {}]   ;;  %s1209_s1 = inlined_call_operand.vmem [shape: bf16[8,36], index: 1, kind: input, shape index: {}]   ;;  %s1210_s2 = inlined_call_operand.vmem [shape: f32[8,1], index: 2, kind: input, shape index: {}]   ;;  %s1211_s3 = inlined_call_operand.hbm [shape: f32[2,8,384], index: 3, kind: output, shape index: {}]  }
   0x1   :  { %9 = vsyncpa [#allocation5], 0  ;;  %s14_s14 = sshll.u32 %s1208_s0, 4  ;;  %s963_s15 = smov [#allocation3]   ;;  %s15_s14 = int_to_ptr.hbm [resolvable:$true] %s14_s14 }
   0x2   :  { %s16_s16 = sshll.u32 %s963_s15, 4  ;;  %s964_s17 = smov 256   ;;  %s17_s16 = int_to_ptr.vmem [resolvable:$true] %s16_s16 }
   0x3   :  { %s965_s18 = smov 16  }
   0x4   :  { %22 = dma.hbm_to_vmem [thread:$0]  %s15_s14, 512, %s17_s16, [#allocation4], %s964_s17, %s964_s17, %s965_s18  }
   0x5   :  { %959 = dma.done.wait [#allocation4], 512  }
   0x6   :  { %960 = vsyncadd [#allocation4], 4294966784  ;;  %v1001_v0 = vld [vmem:[#allocation3] sm:$0xff]  ;;  %v33_v1 = vld [vmem:[#allocation3 + $0x8] sm:$0xf]  ;;  %s966_s0 = smov 127  }
   0x7   :  { %36 = vst [vmem:[#allocation1] ss:$2 sm:$0xff] %v1001_v0  ;;  %v1004_v2 = vld [vmem:[#allocation3 + $0x8] sm:$0xff]  ;;  %s967_s19 = smov 126   ;;  %s968_s20 = smov 110   ;;  %v1038_v52 = vld [vmem:[#allocation3 + $0x10] sm:$0xff] }
   0x8   :  { %38 = vst [vmem:[#allocation1 + $0x10] ss:$2 sm:$0xff] %v33_v1  ;;  %s969_s21 = smov 109   ;;  %s970_s22 = smov 92   ;;  %v324_v53 = vld [vmem:[#allocation3 + $0x18] sm:$0xf] }
   0x9   :  { %s971_s23 = smov 108   ;;  %s972_s24 = smov 91   ;;  %v1045_v62 = vld [vmem:[#allocation3 + $0x18] sm:$0xff]  ;;  %vm76_vm0 = vcmask 1043456   ;;  %vm78_vm1 = vcmask 1039360   ;;  %vm111_vm2 = vcmask 1031168  }
   0xa   :  { %s973_s25 = smov 90   ;;  %vm146_vm3 = vcmask 900096   ;;  %vm179_vm4 = vcmask 891904   ;;  %vm214_vm5 = vcmask 883712   ;;  %vm247_vm6 = vcmask 752640   ;;  %s815_s5 = sshll.u32 %s1211_s3, 4  ;;  %s816_s5 = int_to_ptr.hbm [resolvable:$true] %s815_s5 }
   0xb   :  { %vm282_vm7 = vcmask 744448   ;;  %vm315_vm8 = vcmask 736256   ;;  %vm705_vm9 = vcmask 1041408   ;;  %vm701_vm10 = vcmask 293888   ;;  %s976_s6 = smov 384   ;;  %s977_s7 = smov 24  }
   0xe   :  { %v1006_v3 = vld.sshfl [vmem:[#allocation1] sm:$0xff pattern:$0x75316420]  ;;  %v1008_v4 = vld.sshfl [vmem:[#allocation1 + $0x8] sm:$0xff pattern:$0x75316420] }
   0xf   :  { %53 = vst [vmem:[#allocation1] ss:$2 sm:$0xff] %v1001_v0  ;;  %v1011_v5 = vld.sshfl [vmem:[#allocation1 + $0x10] sm:$0xff pattern:$0x75316420] }
  0x10   :  { %55 = vst [vmem:[#allocation1 + $0x10] ss:$2 sm:$0xff] %v1004_v2 }
  0x16   :  { %v56_v6 = vld.sshfl [vmem:[#allocation1] sm:$0xff pattern:$0x75316420]  ;;  %v57_v7 = vld.sshfl [vmem:[#allocation1 + $0x8] sm:$0xff pattern:$0x75316420] }
  0x17   :  { %v64_v8 = vpack.c.bf16 %v57_v7, %v56_v6  ;;  %89 = vst [vmem:[#allocation1] ss:$2 sm:$0xff] %v1001_v0  ;;  %v58_v9 = vld.sshfl [vmem:[#allocation1 + $0x10] sm:$0xff pattern:$0x75316420] }
  0x18   :  { %v59_v10 = vld.sshfl [vmem:[#allocation1 + $0x18] sm:$0xff pattern:$0x75316420] }
  0x19   :  { %v68_v11 = vrot.slane %v64_v8, 6  ;;  %91 = vst [vmem:[#allocation1 + $0x10] ss:$2 sm:$0xff] %v1004_v2  ;;  %v65_v12 = vpack.c.bf16 %v59_v10, %v58_v9 }
  0x1b   :  { %70 = vrot.lane.b32.xlu0 %v68_v11, %s966_s0  ;;  %v69_v13 = vrot.slane %v65_v12, 6 }
  0x1d   :  { %72 = vrot.lane.b32.xlu1 %v69_v13, %s966_s0 }
  0x1e   :  { %v92_v14 = vld.sshfl [vmem:[#allocation1] sm:$0xff pattern:$0x75316420]  ;;  %v93_v15 = vld.sshfl [vmem:[#allocation1 + $0x8] sm:$0xff pattern:$0x75316420] }
  0x1f   :  { %122 = vst [vmem:[#allocation1] ss:$2 sm:$0xff] %v1001_v0  ;;  %v100_v35 = vpack.c.bf16 %v93_v15, %v92_v14 }
  0x20   :  { %v94_v16 = vld.sshfl [vmem:[#allocation1 + $0x10] sm:$0xff pattern:$0x75316420]  ;;  %v95_v17 = vld.sshfl [vmem:[#allocation1 + $0x18] sm:$0xff pattern:$0x75316420] }
  0x21   :  { %v101_v18 = vpack.c.bf16 %v95_v17, %v94_v16  ;;  %124 = vst [vmem:[#allocation1 + $0x10] ss:$2 sm:$0xff] %v1004_v2  ;;  %104 = vrot.lane.b32.xlu2 %v100_v35, %s967_s19 }
  0x23   :  { %106 = vrot.lane.b32.xlu0 %v101_v18, %s967_s19 }
  0x26   :  { %v125_v19 = vld.sshfl [vmem:[#allocation1] sm:$0xff pattern:$0x75316420]  ;;  %v126_v20 = vld.sshfl [vmem:[#allocation1 + $0x8] sm:$0xff pattern:$0x75316420] }
  0x27   :  { %157 = vst [vmem:[#allocation1] ss:$2 sm:$0xff] %v1001_v0  ;;  %v133_v21 = vpack.c.bf16 %v126_v20, %v125_v19 }
  0x28   :  { %v127_v22 = vld.sshfl [vmem:[#allocation1 + $0x10] sm:$0xff pattern:$0x75316420]  ;;  %v128_v23 = vld.sshfl [vmem:[#allocation1 + $0x18] sm:$0xff pattern:$0x75316420] }
  0x29   :  { %v137_v24 = vrot.slane %v133_v21, 6  ;;  %159 = vst [vmem:[#allocation1 + $0x10] ss:$2 sm:$0xff] %v1004_v2  ;;  %v134_v41 = vpack.c.bf16 %v128_v23, %v127_v22 }
  0x2b   :  { %139 = vrot.lane.b32.xlu1 %v137_v24, %s968_s20  ;;  %v138_v43 = vrot.slane %v134_v41, 6 }
  0x2d   :  { %141 = vrot.lane.b32.xlu2 %v138_v43, %s968_s20 }
  0x2e   :  { %v160_v25 = vld.sshfl [vmem:[#allocation1] sm:$0xff pattern:$0x75316420]  ;;  %v161_v26 = vld.sshfl [vmem:[#allocation1 + $0x8] sm:$0xff pattern:$0x75316420] }
  0x2f   :  { %190 = vst [vmem:[#allocation1] ss:$2 sm:$0xff] %v1001_v0  ;;  %v168_v27 = vpack.c.bf16 %v161_v26, %v160_v25 }
  0x30   :  { %v162_v28 = vld.sshfl [vmem:[#allocation1 + $0x10] sm:$0xff pattern:$0x75316420]  ;;  %v163_v29 = vld.sshfl [vmem:[#allocation1 + $0x18] sm:$0xff pattern:$0x75316420] }
  0x31   :  { %192 = vst [vmem:[#allocation1 + $0x10] ss:$2 sm:$0xff] %v1004_v2  ;;  %v169_v34 = vpack.c.bf16 %v163_v29, %v162_v28 }
  0x33   :  { %172 = vrot.lane.b32.xlu1 %v168_v27, %s969_s21 }
  0x36   :  { %v193_v30 = vld.sshfl [vmem:[#allocation1] sm:$0xff pattern:$0x75316420]  ;;  %v194_v31 = vld.sshfl [vmem:[#allocation1 + $0x8] sm:$0xff pattern:$0x75316420] }
  0x37   :  { %225 = vst [vmem:[#allocation1] ss:$2 sm:$0xff] %v1001_v0  ;;  %v201_v48 = vpack.c.bf16 %v194_v31, %v193_v30 }
  0x38   :  { %v195_v32 = vld.sshfl [vmem:[#allocation1 + $0x10] sm:$0xff pattern:$0x75316420]  ;;  %v196_v33 = vld.sshfl [vmem:[#allocation1 + $0x18] sm:$0xff pattern:$0x75316420] }
  0x39   :  { %227 = vst [vmem:[#allocation1 + $0x10] ss:$2 sm:$0xff] %v1004_v2  ;;  %v205_v50 = vrot.slane %v201_v48, 6  ;;  %v202_v58 = vpack.c.bf16 %v196_v33, %v195_v32 }
  0x3b   :  { %174 = vrot.lane.b32.xlu1 %v169_v34, %s969_s21  ;;  %207 = vrot.lane.b32.xlu2 %v205_v50, %s971_s23  ;;  %v206_v60 = vrot.slane %v202_v58, 6 }
  0x3e   :  { %v228_v36 = vld.sshfl [vmem:[#allocation1] sm:$0xff pattern:$0x75316420]  ;;  %v229_v37 = vld.sshfl [vmem:[#allocation1 + $0x8] sm:$0xff pattern:$0x75316420] }
  0x3f   :  { %v236_v38 = vpack.c.bf16 %v229_v37, %v228_v36  ;;  %258 = vst [vmem:[#allocation1] ss:$2 sm:$0xff] %v1001_v0 }
  0x40   :  { %v230_v39 = vld.sshfl [vmem:[#allocation1 + $0x10] sm:$0xff pattern:$0x75316420]  ;;  %v231_v40 = vld.sshfl [vmem:[#allocation1 + $0x18] sm:$0xff pattern:$0x75316420] }
  0x41   :  { %240 = vrot.lane.b32.xlu0 %v236_v38, %s970_s22  ;;  %260 = vst [vmem:[#allocation1 + $0x10] ss:$2 sm:$0xff] %v1004_v2  ;;  %v237_v42 = vpack.c.bf16 %v231_v40, %v230_v39 }
  0x43   :  { %242 = vrot.lane.b32.xlu1 %v237_v42, %s970_s22  ;;  %209 = vrot.lane.b32.xlu2 %v206_v60, %s971_s23 }
  0x46   :  { %v261_v44 = vld.sshfl [vmem:[#allocation1] sm:$0xff pattern:$0x75316420]  ;;  %v262_v45 = vld.sshfl [vmem:[#allocation1 + $0x8] sm:$0xff pattern:$0x75316420] }
  0x47   :  { %293 = vst [vmem:[#allocation1] ss:$2 sm:$0xff] %v1001_v0  ;;  %v269_v61 = vpack.c.bf16 %v262_v45, %v261_v44 }
  0x48   :  { %v263_v46 = vld.sshfl [vmem:[#allocation1 + $0x10] sm:$0xff pattern:$0x75316420]  ;;  %v264_v47 = vld.sshfl [vmem:[#allocation1 + $0x18] sm:$0xff pattern:$0x75316420] }
  0x49   :  { %v270_v49 = vpack.c.bf16 %v264_v47, %v263_v46  ;;  %295 = vst [vmem:[#allocation1 + $0x10] ss:$2 sm:$0xff] %v1004_v2  ;;  %v273_v2 = vrot.slane %v269_v61, 6 }
  0x4b   :  { %v274_v51 = vrot.slane %v270_v49, 6  ;;  %275 = vrot.lane.b32.xlu2 %v273_v2, %s972_s24 }
  0x4d   :  { %277 = vrot.lane.b32.xlu0 %v274_v51, %s972_s24 }
  0x4e   :  { %v296_v54 = vld.sshfl [vmem:[#allocation1] sm:$0xff pattern:$0x75316420]  ;;  %v297_v55 = vld.sshfl [vmem:[#allocation1 + $0x8] sm:$0xff pattern:$0x75316420] }
  0x4f   :  { %327 = vst [vmem:[#allocation1] ss:$2 sm:$0xff] %v1038_v52  ;;  %v304_v59 = vpack.c.bf16 %v297_v55, %v296_v54 }
  0x50   :  { %v298_v56 = vld.sshfl [vmem:[#allocation1 + $0x10] sm:$0xff pattern:$0x75316420]  ;;  %v299_v57 = vld.sshfl [vmem:[#allocation1 + $0x18] sm:$0xff pattern:$0x75316420] }
  0x51   :  { %329 = vst [vmem:[#allocation1 + $0x10] ss:$2 sm:$0xff] %v324_v53  ;;  %v305_v6 = vpack.c.bf16 %v299_v57, %v298_v56 }
  0x55   :  { %308 = vrot.lane.b32.xlu0 %v304_v59, %s973_s25 }
  0x56   :  { %v1047_v63 = vld.sshfl [vmem:[#allocation1] sm:$0xff pattern:$0x75316420]  ;;  %v1049_v0 = vld.sshfl [vmem:[#allocation1 + $0x8] sm:$0xff pattern:$0x75316420] }
  0x57   :  { %344 = vst [vmem:[#allocation1] ss:$2 sm:$0xff] %v1038_v52 }
  0x58   :  { %v1052_v1 = vld.sshfl [vmem:[#allocation1 + $0x10] sm:$0xff pattern:$0x75316420] }
  0x59   :  { %346 = vst [vmem:[#allocation1 + $0x10] ss:$2 sm:$0xff] %v1045_v62 }
  0x5d   :  { %310 = vrot.lane.b32.xlu0 %v305_v6, %s973_s25 }
  0x5e   :  { %v1057_v7 = vld.sshfl [vmem:[#allocation1] sm:$0xff pattern:$0x75316420]  ;;  %v1059_v8 = vld.sshfl [vmem:[#allocation1 + $0x8] sm:$0xff pattern:$0x75316420] }
  0x5f   :  { %378 = vst [vmem:[#allocation1] ss:$2 sm:$0xff] %v1038_v52  ;;  %v355_v40 = vpack.c.bf16 %v1059_v8, %v1057_v7 }
  0x60   :  { %v1062_v9 = vld.sshfl [vmem:[#allocation1 + $0x10] sm:$0xff pattern:$0x75316420]  ;;  %v1064_v10 = vld.sshfl [vmem:[#allocation1 + $0x18] sm:$0xff pattern:$0x75316420] }
  0x61   :  { %380 = vst [vmem:[#allocation1 + $0x10] ss:$2 sm:$0xff] %v1045_v62  ;;  %v356_v53 = vpack.c.bf16 %v1064_v10, %v1062_v9 }
  0x63   :  { %v360_v61 = vrot.slane %v356_v53, 6 }
  0x66   :  { %v1067_v11 = vld.sshfl [vmem:[#allocation1] sm:$0xff pattern:$0x75316420]  ;;  %v1069_v12 = vld.sshfl [vmem:[#allocation1 + $0x8] sm:$0xff pattern:$0x75316420] }
  0x67   :  { %410 = vst [vmem:[#allocation1] ss:$2 sm:$0xff] %v1038_v52 }
  0x68   :  { %v1072_v13 = vld.sshfl [vmem:[#allocation1 + $0x10] sm:$0xff pattern:$0x75316420]  ;;  %v1074_v14 = vld.sshfl [vmem:[#allocation1 + $0x18] sm:$0xff pattern:$0x75316420] }
  0x69   :  { %412 = vst [vmem:[#allocation1 + $0x10] ss:$2 sm:$0xff] %v1045_v62  ;;  %v390_v56 = vpack.c.bf16 %v1074_v14, %v1072_v13 }
  0x6e   :  { %v1077_v15 = vld.sshfl [vmem:[#allocation1] sm:$0xff pattern:$0x75316420]  ;;  %v1079_v16 = vld.sshfl [vmem:[#allocation1 + $0x8] sm:$0xff pattern:$0x75316420] }
  0x6f   :  { %444 = vst [vmem:[#allocation1] ss:$2 sm:$0xff] %v1038_v52  ;;  %v421_v14 = vpack.c.bf16 %v1079_v16, %v1077_v15 }
  0x70   :  { %v1082_v17 = vld.sshfl [vmem:[#allocation1 + $0x10] sm:$0xff pattern:$0x75316420]  ;;  %v1084_v18 = vld.sshfl [vmem:[#allocation1 + $0x18] sm:$0xff pattern:$0x75316420] }
  0x71   :  { %446 = vst [vmem:[#allocation1 + $0x10] ss:$2 sm:$0xff] %v1045_v62  ;;  %v422_v15 = vpack.c.bf16 %v1084_v18, %v1082_v17 }
  0x76   :  { %v447_v19 = vld.sshfl [vmem:[#allocation1] sm:$0xff pattern:$0x75316420]  ;;  %v448_v20 = vld.sshfl [vmem:[#allocation1 + $0x8] sm:$0xff pattern:$0x75316420] }
  0x77   :  { %v455_v21 = vpack.c.bf16 %v448_v20, %v447_v19  ;;  %476 = vst [vmem:[#allocation1] ss:$2 sm:$0xff] %v1038_v52 }
  0x78   :  { %v449_v22 = vld.sshfl [vmem:[#allocation1 + $0x10] sm:$0xff pattern:$0x75316420]  ;;  %v450_v23 = vld.sshfl [vmem:[#allocation1 + $0x18] sm:$0xff pattern:$0x75316420] }
  0x79   :  { %459 = vrot.lane.b32.xlu0 %v455_v21, %s969_s21  ;;  %v456_v24 = vpack.c.bf16 %v450_v23, %v449_v22  ;;  %478 = vst [vmem:[#allocation1 + $0x10] ss:$2 sm:$0xff] %v1045_v62  ;;  %v425_v23 = vrot.slane %v421_v14, 6 }
  0x7b   :  { %461 = vrot.lane.b32.xlu1 %v456_v24, %s969_s21  ;;  %v105_v60 = vpop.permute.xlu2 %104  ;;  %v359_v24 = vrot.slane %v355_v40, 6 }
  0x7c   :  { %v108_v2 = vrot.slane %v105_v60, 4 }
  0x7e   :  { %v479_v25 = vld.sshfl [vmem:[#allocation1] sm:$0xff pattern:$0x75316420]  ;;  %v480_v26 = vld.sshfl [vmem:[#allocation1 + $0x8] sm:$0xff pattern:$0x75316420] }
  0x7f   :  { %510 = vst [vmem:[#allocation1] ss:$2 sm:$0xff] %v1038_v52  ;;  %v487_v27 = vpack.c.bf16 %v480_v26, %v479_v25  ;;  %v389_v26 = vpack.c.bf16 %v1069_v12, %v1067_v11  ;;  %v426_v11 = vrot.slane %v422_v15, 6 }
  0x80   :  { %v481_v28 = vld.sshfl [vmem:[#allocation1 + $0x10] sm:$0xff pattern:$0x75316420]  ;;  %v482_v29 = vld.sshfl [vmem:[#allocation1 + $0x18] sm:$0xff pattern:$0x75316420] }
  0x81   :  { %v488_v30 = vpack.c.bf16 %v482_v29, %v481_v28  ;;  %512 = vst [vmem:[#allocation1 + $0x10] ss:$2 sm:$0xff] %v1045_v62  ;;  %v491_v31 = vrot.slane %v487_v27, 6 }
  0x83   :  { %v492_v32 = vrot.slane %v488_v30, 6  ;;  %493 = vrot.lane.b32.xlu2 %v491_v31, %s971_s23 }
  0x85   :  { %495 = vrot.lane.b32.xlu0 %v492_v32, %s971_s23 }
  0x86   :  { %v513_v33 = vld.sshfl [vmem:[#allocation1] sm:$0xff pattern:$0x75316420]  ;;  %v514_v34 = vld.sshfl [vmem:[#allocation1 + $0x8] sm:$0xff pattern:$0x75316420] }
  0x87   :  { %v521_v35 = vpack.c.bf16 %v514_v34, %v513_v33  ;;  %542 = vst [vmem:[#allocation1] ss:$2 sm:$0xff] %v1038_v52  ;;  %v142_v22 = vpop.permute.xlu2 %141 }
  0x88   :  { %v515_v36 = vld.sshfl [vmem:[#allocation1 + $0x10] sm:$0xff pattern:$0x75316420]  ;;  %v516_v37 = vld.sshfl [vmem:[#allocation1 + $0x18] sm:$0xff pattern:$0x75316420] }
  0x89   :  { %525 = vrot.lane.b32.xlu1 %v521_v35, %s970_s22  ;;  %544 = vst [vmem:[#allocation1 + $0x10] ss:$2 sm:$0xff] %v1045_v62  ;;  %v522_v38 = vpack.c.bf16 %v516_v37, %v515_v36  ;;  %v144_v25 = vrot.slane %v142_v22, 4  ;;  %v45_v36 = vpack.c.bf16 %v1008_v4, %v1006_v3 }
  0x8b   :  { %527 = vrot.lane.b32.xlu2 %v522_v38, %s970_s22  ;;  %v148_v28 = vsel %vm146_vm3, %v142_v22, %v144_v25  ;;  %47 = vst [vmem:[#allocation2] sm:$0x33] %v45_v36 }
  0x8c   :  { %152 = vst [vmem:[#allocation2 + $0x20] sm:$0xc] %v148_v28 }
  0x8d   :  { %v71_v39 = vpop.permute.xlu0 %70 }
  0x8e   :  { %v545_v41 = vld.sshfl [vmem:[#allocation1] sm:$0xff pattern:$0x75316420]  ;;  %v546_v42 = vld.sshfl [vmem:[#allocation1 + $0x8] sm:$0xff pattern:$0x75316420] }
  0x8f   :  { %v553_v43 = vpack.c.bf16 %v546_v42, %v545_v41  ;;  %576 = vst [vmem:[#allocation1] ss:$2 sm:$0xff] %v1038_v52  ;;  %v74_v44 = vrot.slane %v71_v39, 4  ;;  %v73_v47 = vpop.permute.xlu1 %72  ;;  %v46_v41 = vpack.c.bf16 %v1011_v5, %v1011_v5 }
  0x90   :  { %v547_v45 = vld.sshfl [vmem:[#allocation1 + $0x10] sm:$0xff pattern:$0x75316420]  ;;  %v548_v46 = vld.sshfl [vmem:[#allocation1 + $0x18] sm:$0xff pattern:$0x75316420] }
  0x91   :  { %v554_v48 = vpack.c.bf16 %v548_v46, %v547_v45  ;;  %v557_v49 = vrot.slane %v553_v43, 6  ;;  %578 = vst [vmem:[#allocation1 + $0x10] ss:$2 sm:$0xff] %v1045_v62  ;;  %v75_v50 = vrot.slane %v73_v47, 4 }
  0x92   :  { %48 = vst [vmem:[#allocation2 + $0x8] sm:$0x3] %v46_v41 }
  0x93   :  { %v558_v51 = vrot.slane %v554_v48, 6  ;;  %559 = vrot.lane.b32.xlu0 %v557_v49, %s972_s24  ;;  %v77_v54 = vsel %vm76_vm0, %v74_v44, %v75_v50  ;;  %v80_v52 = vsel %vm78_vm1, %v73_v47, %v75_v50 }
  0x94   :  { %v79_v55 = vsel %vm78_vm1, %v71_v39, %v77_v54  ;;  %84 = vst [vmem:[#allocation2 + $0x8] sm:$0xc] %v80_v52 }
  0x95   :  { %561 = vrot.lane.b32.xlu1 %v558_v51, %s972_s24  ;;  %83 = vst [vmem:[#allocation2] sm:$0xcc] %v79_v55  ;;  %v107_v59 = vpop.permute.xlu0 %106  ;;  %v208_v30 = vpop.permute.xlu2 %207 }
  0x96   :  { %v579_v57 = vld.sshfl [vmem:[#allocation1] sm:$0xff pattern:$0x75316420]  ;;  %v580_v58 = vld.sshfl [vmem:[#allocation1 + $0x8] sm:$0xff pattern:$0x75316420] }
  0x97   :  { %v109_v62 = vrot.slane %v107_v59, 4  ;;  %v587_v8 = vpack.c.bf16 %v580_v58, %v579_v57  ;;  %v211_v31 = vrot.slane %v208_v30, 4 }
  0x98   :  { %v581_v6 = vld.sshfl [vmem:[#allocation1 + $0x10] sm:$0xff pattern:$0x75316420]  ;;  %v582_v7 = vld.sshfl [vmem:[#allocation1 + $0x18] sm:$0xff pattern:$0x75316420] }
  0x99   :  { %v588_v9 = vpack.c.bf16 %v582_v7, %v581_v6  ;;  %v113_v10 = vsel %vm111_vm2, %v107_v59, %v109_v62  ;;  %v110_v19 = vsel %vm76_vm0, %v108_v2, %v109_v62 }
  0x9a   :  { %117 = vst [vmem:[#allocation2 + $0x20] sm:$0x3] %v113_v10  ;;  %v112_v13 = vsel %vm111_vm2, %v105_v60, %v110_v19 }
  0x9b   :  { %363 = vrot.lane.b32.xlu0 %v360_v61, %s966_s0  ;;  %593 = vrot.lane.b32.xlu2 %v588_v9, %s973_s25  ;;  %116 = vst [vmem:[#allocation2 + $0x18] sm:$0x33] %v112_v13 }
  0x9c   :  { %v830_v22 = vld [vmem:[#allocation2] sm:$0xf] }
  0x9d   :  { %591 = vrot.lane.b32.xlu1 %v587_v8, %s973_s25  ;;  %v140_v20 = vpop.permute.xlu1 %139  ;;  %v210_v33 = vpop.permute.xlu2 %209 }
  0x9e   :  { %v143_v21 = vrot.slane %v140_v20, 4  ;;  %v212_v35 = vrot.slane %v210_v33, 4 }
  0xa0   :  { %v145_v27 = vsel %vm76_vm0, %v143_v21, %v144_v25  ;;  %v213_v37 = vsel %vm76_vm0, %v211_v31, %v212_v35  ;;  %v216_v40 = vsel %vm214_vm5, %v210_v33, %v212_v35 }
  0xa1   :  { %v147_v29 = vsel %vm146_vm3, %v140_v20, %v145_v27  ;;  %v215_v39 = vsel %vm214_vm5, %v208_v30, %v213_v37  ;;  %220 = vst [vmem:[#allocation2 + $0x38] sm:$0xc] %v216_v40 }
  0xa2   :  { %151 = vst [vmem:[#allocation2 + $0x18] sm:$0xcc] %v147_v29 }
  0xa3   :  { %427 = vrot.lane.b32.xlu0 %v425_v23, %s968_s20  ;;  %361 = vrot.lane.b32.xlu2 %v359_v24, %s966_s0  ;;  %219 = vst [vmem:[#allocation2 + $0x30] sm:$0xcc] %v215_v39  ;;  %v882_v24 = vld [vmem:[#allocation2 + $0x4] sm:$0xf]  ;;  %v336_v39 = vpack.c.bf16 %v1049_v0, %v1047_v63 }
  0xa5   :  { %393 = vrot.lane.b32.xlu1 %v389_v26, %s967_s19  ;;  %v173_v16 = vpop.permute.xlu1 %172  ;;  %v276_v47 = vpop.permute.xlu2 %275  ;;  %338 = vst [vmem:[#allocation2 + $0xc] sm:$0x33] %v336_v39 }
  0xa6   :  { %v176_v12 = vrot.slane %v173_v16, 4  ;;  %v279_v48 = vrot.slane %v276_v47, 4 }
  0xa9   :  { %v885_v23 = vld [vmem:[#allocation2 + $0x14] sm:$0xf0]  ;;  %v832_v25 = vld [vmem:[#allocation2 + $0x18] sm:$0xf0] }
  0xaa   :  { %v831_v28 = vor.u32 %v885_v23, %v830_v22  ;;  %v835_v29 = vor.u32 %v882_v24, %v832_v25 }
  0xab   :  { %395 = vrot.lane.b32.xlu2 %v390_v56, %s967_s19 }
  0xad   :  { %429 = vrot.lane.b32.xlu1 %v426_v11, %s968_s20  ;;  %v175_v32 = vpop.permute.xlu1 %174 }
  0xae   :  { %v177_v34 = vrot.slane %v175_v32, 4 }
  0xb0   :  { %v178_v17 = vsel %vm76_vm0, %v176_v12, %v177_v34  ;;  %v181_v18 = vsel %vm179_vm4, %v175_v32, %v177_v34 }
  0xb1   :  { %v180_v38 = vsel %vm179_vm4, %v173_v16, %v178_v17  ;;  %185 = vst [vmem:[#allocation2 + $0x38] sm:$0x3] %v181_v18 }
  0xb2   :  { %184 = vst [vmem:[#allocation2 + $0x30] sm:$0x33] %v180_v38  ;;  %v337_v38 = vpack.c.bf16 %v1052_v1, %v1052_v1  ;;  %v1169_v1 = vld [vmem:[%s1209_s1] sm:$0xf] }
  0xb3   :  { %v241_v42 = vpop.permute.xlu0 %240 }
  0xb4   :  { %v244_v3 = vrot.slane %v241_v42, 4  ;;  %339 = vst [vmem:[#allocation2 + $0x14] sm:$0x3] %v337_v38 }
  0xb5   :  { %v243_v4 = vpop.permute.xlu1 %242 }
  0xb6   :  { %v245_v43 = vrot.slane %v243_v4, 4 }
  0xb8   :  { %v246_v44 = vsel %vm76_vm0, %v244_v3, %v245_v43  ;;  %v249_v45 = vsel %vm247_vm6, %v243_v4, %v245_v43 }
  0xb9   :  { %v248_v46 = vsel %vm247_vm6, %v241_v42, %v246_v44  ;;  %253 = vst [vmem:[#allocation2 + $0x50] sm:$0x3] %v249_v45  ;;  %v854_v2 = vld [vmem:[#allocation2 + $0x30] sm:$0xf]  ;;  %v888_v10 = vld [vmem:[#allocation2 + $0x34] sm:$0xf] }
  0xba   :  { %252 = vst [vmem:[#allocation2 + $0x48] sm:$0x33] %v248_v46 }
  0xbf   :  { %v278_v5 = vpop.permute.xlu0 %277 }
  0xc0   :  { %v280_v49 = vrot.slane %v278_v5, 4 }
  0xc2   :  { %v284_v50 = vsel %vm282_vm7, %v278_v5, %v280_v49  ;;  %v281_v51 = vsel %vm76_vm0, %v279_v48, %v280_v49 }
  0xc3   :  { %288 = vst [vmem:[#allocation2 + $0x50] sm:$0xc] %v284_v50  ;;  %v283_v53 = vsel %vm282_vm7, %v276_v47, %v281_v51 }
  0xc4   :  { %287 = vst [vmem:[#allocation2 + $0x48] sm:$0xcc] %v283_v53 }
  0xc7   :  { %v309_v54 = vpop.permute.xlu0 %308 }
  0xc8   :  { %v312_v52 = vrot.slane %v309_v54, 4 }
  0xcb   :  { %v891_v9 = vld [vmem:[#allocation2 + $0x44] sm:$0xf0]  ;;  %v856_v19 = vld [vmem:[#allocation2 + $0x48] sm:$0xf0] }
  0xcc   :  { %v855_v20 = vor.u32 %v891_v9, %v854_v2  ;;  %v859_v21 = vor.u32 %v888_v10, %v856_v19  ;;  %v974_v2 = vmov 0  }
  0xcd   :  { %909 = vset.pattern.permute.xlu2 %v974_v2  ;;  %910 = vset.pattern.permute.xlu0 %v974_v2 }
  0xcf   :  { %v311_v55 = vpop.permute.xlu0 %310 }
  0xd0   :  { %v313_v56 = vrot.slane %v311_v55, 4 }
  0xd2   :  { %v314_v57 = vsel %vm76_vm0, %v312_v52, %v313_v56  ;;  %v317_v58 = vsel %vm315_vm8, %v311_v55, %v313_v56 }
  0xd3   :  { %v316_v59 = vsel %vm315_vm8, %v309_v54, %v314_v57  ;;  %321 = vst [vmem:[#allocation2 + $0x68] sm:$0x3] %v317_v58 }
  0xd4   :  { %320 = vst [vmem:[#allocation2 + $0x60] sm:$0x33] %v316_v59 }
  0xdb   :  { %v617_v60 = vld [vmem:[#allocation2 + $0x60] sm:$0x33] }
  0xdc   :  { %v665_v61 = vunpack.c.l.b16 %v617_v60  ;;  %v666_v62 = vunpack.c.h.b16 %v617_v60 }
  0xdd   :  { %v494_v6 = vpop.permute.xlu2 %493 }
  0xde   :  { %v683_v7 = vpack.c.b16 %v665_v61, %v665_v61  ;;  %v684_v8 = vpack.c.b16 %v666_v62, %v666_v62  ;;  %v497_v35 = vrot.slane %v494_v6, 4  ;;  %v620_v61 = vld [vmem:[%s1210_s2] sm:$0xff]  ;;  %s975_s2 = smov [#allocation6]  }
  0xdf   :  { %623 = vperm.xlu2 %909, %v620_v61   ;;  %s813_s29 = sshll.u32 %s975_s2, 4  ;;  %s814_s29 = int_to_ptr.vmem [resolvable:$true] %s813_s29 }
  0xe0   :  { %v707_v13 = vsel %vm705_vm9, %v683_v7, 0  ;;  %v710_v14 = vsel %vm705_vm9, %v684_v8, 0 }
  0xe1   :  { %729 = vmatpush.bf16.msra.mxu0 %v707_v13  ;;  %742 = vmatpush.bf16.msra.mxu1 %v710_v14 }
  0xe5   :  { %730 = vmatpush.bf16.msra.mxu0 %v855_v20  ;;  %743 = vmatpush.bf16.msra.mxu1 %v859_v21  ;;  %v528_v26 = vpop.permute.xlu2 %527 }
  0xe6   :  { %v530_v27 = vrot.slane %v528_v26, 4 }
  0xe8   :  { %v533_v15 = vsel %vm247_vm6, %v528_v26, %v530_v27 }
  0xe9   :  { %731 = vmatpush.bf16.msra.mxu0 %v831_v28  ;;  %744 = vmatpush.bf16.msra.mxu1 %v835_v29  ;;  %537 = vst [vmem:[#allocation2 + $0x5c] sm:$0x3] %v533_v15  ;;  %v862_v15 = vld [vmem:[#allocation2 + $0x38] sm:$0xf] }
  0xeb   :  { %v460_v16 = vpop.permute.xlu0 %459 }
  0xec   :  { %v463_v30 = vrot.slane %v460_v16, 4  ;;  %876 = vmatmul.msk.bf16.vlgmr.msra.gmra.mxu0 %vm701_vm10, %v1169_v1  ;;  %877 = vmatmul.msk.bf16.vlgmr.msra.gmra.mxu1 %vm701_vm10, %v1169_v1 }
  0xed   :  { %v462_v11 = vpop.permute.xlu1 %461 }
  0xee   :  { %v464_v12 = vrot.slane %v462_v11, 4 }
  0xf0   :  { %v465_v31 = vsel %vm76_vm0, %v463_v30, %v464_v12  ;;  %v467_v32 = vsel %vm179_vm4, %v462_v11, %v464_v12 }
  0xf1   :  { %v466_v33 = vsel %vm179_vm4, %v460_v16, %v465_v31  ;;  %471 = vst [vmem:[#allocation2 + $0x44] sm:$0x3] %v467_v32  ;;  %v892_v16 = vld [vmem:[#allocation2 + $0x4c] sm:$0xf0] }
  0xf2   :  { %470 = vst [vmem:[#allocation2 + $0x3c] sm:$0x33] %v466_v33  ;;  %v863_v38 = vor.u32 %v892_v16, %v862_v15 }
  0xf5   :  { %v594_v34 = vpop.permute.xlu2 %593 }
  0xf6   :  { %v596_v36 = vrot.slane %v594_v34, 4 }
  0xf7   :  { %v496_v17 = vpop.permute.xlu0 %495 }
  0xf8   :  { %v498_v18 = vrot.slane %v496_v17, 4  ;;  %v599_v37 = vsel %vm315_vm8, %v594_v34, %v596_v36 }
  0xf9   :  { %603 = vst [vmem:[#allocation2 + $0x74] sm:$0x3] %v599_v37 }
  0xfa   :  { %v499_v40 = vsel %vm76_vm0, %v497_v35, %v498_v18  ;;  %v501_v41 = vsel %vm214_vm5, %v496_v17, %v498_v18 }
  0xfb   :  { %v500_v42 = vsel %vm214_vm5, %v494_v6, %v499_v40  ;;  %505 = vst [vmem:[#allocation2 + $0x44] sm:$0xc] %v501_v41  ;;  %v526_v3 = vpop.permute.xlu1 %525 }
  0xfc   :  { %504 = vst [vmem:[#allocation2 + $0x3c] sm:$0xcc] %v500_v42  ;;  %v529_v4 = vrot.slane %v526_v3, 4 }
  0xfd   :  { %v362_v43 = vpop.permute.xlu2 %361 }
  0xfe   :  { %v531_v44 = vsel %vm76_vm0, %v529_v4, %v530_v27  ;;  %v365_v54 = vrot.slane %v362_v43, 4  ;;  %v838_v4 = vld [vmem:[#allocation2 + $0x8] sm:$0xf] }
  0xff   :  { %v532_v63 = vsel %vm247_vm6, %v526_v3, %v531_v44 }
 0x100   :  { %536 = vst [vmem:[#allocation2 + $0x54] sm:$0x33] %v532_v63 }
 0x102   :  { %v890_v41 = vld [vmem:[#allocation2 + $0x44] sm:$0xf] }
 0x103   :  { %v889_v18 = vld [vmem:[#allocation2 + $0x3c] sm:$0xf]  ;;  %v870_v40 = vld [vmem:[#allocation2 + $0x40] sm:$0xf] }
 0x105   :  { %v560_v0 = vpop.permute.xlu0 %559  ;;  %v396_v45 = vpop.permute.xlu2 %395 }
 0x106   :  { %v563_v46 = vrot.slane %v560_v0, 4  ;;  %v398_v47 = vrot.slane %v396_v45, 4 }
 0x107   :  { %v562_v48 = vpop.permute.xlu1 %561 }
 0x108   :  { %v564_v5 = vrot.slane %v562_v48, 4  ;;  %v401_v49 = vsel %vm111_vm2, %v396_v45, %v398_v47 }
 0x109   :  { %405 = vst [vmem:[#allocation2 + $0x2c] sm:$0x3] %v401_v49 }
 0x10a   :  { %v567_v50 = vsel %vm282_vm7, %v562_v48, %v564_v5  ;;  %v565_v51 = vsel %vm76_vm0, %v563_v46, %v564_v5 }
 0x10b   :  { %571 = vst [vmem:[#allocation2 + $0x5c] sm:$0xc] %v567_v50  ;;  %v566_v53 = vsel %vm282_vm7, %v560_v0, %v565_v51 }
 0x10c   :  { %570 = vst [vmem:[#allocation2 + $0x54] sm:$0xcc] %v566_v53 }
 0x10d   :  { %v364_v52 = vpop.permute.xlu0 %363 }
 0x10e   :  { %v366_v55 = vrot.slane %v364_v52, 4 }
 0x10f   :  { %v592_v56 = vpop.permute.xlu1 %591 }
 0x110   :  { %v595_v57 = vrot.slane %v592_v56, 4  ;;  %v367_v58 = vsel %vm76_vm0, %v365_v54, %v366_v55  ;;  %v369_v59 = vsel %vm78_vm1, %v364_v52, %v366_v55 }
 0x111   :  { %v368_v60 = vsel %vm78_vm1, %v362_v43, %v367_v58  ;;  %373 = vst [vmem:[#allocation2 + $0x14] sm:$0xc] %v369_v59  ;;  %v886_v43 = vld [vmem:[#allocation2 + $0x1c] sm:$0xf0] }
 0x112   :  { %v597_v62 = vsel %vm76_vm0, %v595_v57, %v596_v36  ;;  %372 = vst [vmem:[#allocation2 + $0xc] sm:$0xcc] %v368_v60  ;;  %v872_v35 = vld [vmem:[#allocation2 + $0x58] sm:$0xf0]  ;;  %v839_v44 = vor.u32 %v886_v43, %v838_v4 }
 0x113   :  { %v598_v6 = vsel %vm315_vm8, %v592_v56, %v597_v62  ;;  %v864_v32 = vld [vmem:[#allocation2 + $0x50] sm:$0xf0]  ;;  %v893_v34 = vld [vmem:[#allocation2 + $0x54] sm:$0xf0]  ;;  %v875_v3 = vor.u32 %v890_v41, %v872_v35 }
 0x114   :  { %602 = vst [vmem:[#allocation2 + $0x6c] sm:$0x33] %v598_v6  ;;  %v867_v39 = vor.u32 %v889_v18, %v864_v32  ;;  %v871_v42 = vor.u32 %v893_v34, %v870_v40 }
 0x115   :  { %v428_v10 = vpop.permute.xlu0 %427 }
 0x116   :  { %v431_v24 = vrot.slane %v428_v10, 4 }
 0x117   :  { %v394_v7 = vpop.permute.xlu1 %393 }
 0x118   :  { %v397_v8 = vrot.slane %v394_v7, 4  ;;  %v884_v63 = vld [vmem:[#allocation2 + $0x14] sm:$0xf] }
 0x119   :  { %v883_v45 = vld [vmem:[#allocation2 + $0xc] sm:$0xf]  ;;  %v846_v48 = vld [vmem:[#allocation2 + $0x10] sm:$0xf] }
 0x11a   :  { %v399_v9 = vsel %vm76_vm0, %v397_v8, %v398_v47 }
 0x11b   :  { %v400_v19 = vsel %vm111_vm2, %v394_v7, %v399_v9  ;;  %v618_v13 = vld [vmem:[#allocation2 + $0x68] sm:$0x33]  ;;  %v619_v14 = vld [vmem:[#allocation2 + $0x70] sm:$0x33] }
 0x11c   :  { %404 = vst [vmem:[#allocation2 + $0x24] sm:$0x33] %v400_v19  ;;  %v667_v20 = vunpack.c.l.b16 %v618_v13  ;;  %v668_v21 = vunpack.c.h.b16 %v618_v13  ;;  %v669_v22 = vunpack.c.l.b16 %v619_v14  ;;  %v670_v23 = vunpack.c.h.b16 %v619_v14 }
 0x11e   :  { %v685_v25 = vpack.c.b16 %v667_v20, %v667_v20  ;;  %v686_v26 = vpack.c.b16 %v668_v21, %v668_v21  ;;  %v687_v27 = vpack.c.b16 %v669_v22, %v669_v22  ;;  %v688_v28 = vpack.c.b16 %v670_v23, %v670_v23 }
 0x11f   :  { %v430_v29 = vpop.permute.xlu1 %429 }
 0x120   :  { %v432_v30 = vrot.slane %v430_v29, 4  ;;  %v713_v11 = vsel %vm705_vm9, %v685_v25, 0  ;;  %v716_v12 = vsel %vm705_vm9, %v686_v26, 0  ;;  %v719_v31 = vsel %vm705_vm9, %v687_v27, 0 }
 0x121   :  { %755 = vmatpush.bf16.msra.mxu2 %v713_v11  ;;  %768 = vmatpush.bf16.msra.mxu3 %v716_v12  ;;  %v722_v33 = vsel %vm705_vm9, %v688_v28, 0 }
 0x122   :  { %v435_v36 = vsel %vm146_vm3, %v430_v29, %v432_v30  ;;  %v433_v17 = vsel %vm76_vm0, %v431_v24, %v432_v30  ;;  %781 = vmatpush.bf16.msrb.mxu0 %v719_v31  ;;  %794 = vmatpush.bf16.msrb.mxu1 %v722_v33 }
 0x123   :  { %439 = vst [vmem:[#allocation2 + $0x2c] sm:$0xc] %v435_v36  ;;  %v434_v37 = vsel %vm146_vm3, %v428_v10, %v433_v17 }
 0x124   :  { %438 = vst [vmem:[#allocation2 + $0x24] sm:$0xcc] %v434_v37 }
 0x125   :  { %756 = vmatpush.bf16.msra.mxu2 %v863_v38  ;;  %769 = vmatpush.bf16.msra.mxu3 %v867_v39 }
 0x126   :  { %782 = vmatpush.bf16.msrb.mxu0 %v871_v42  ;;  %795 = vmatpush.bf16.msrb.mxu1 %v875_v3 }
 0x129   :  { %757 = vmatpush.bf16.msra.mxu2 %v839_v44 }
 0x12a   :  { %v848_v0 = vld [vmem:[#allocation2 + $0x28] sm:$0xf0] }
 0x12b   :  { %v851_v46 = vor.u32 %v884_v63, %v848_v0  ;;  %v840_v47 = vld [vmem:[#allocation2 + $0x20] sm:$0xf0]  ;;  %v887_v5 = vld [vmem:[#allocation2 + $0x24] sm:$0xf0] }
 0x12c   :  { %878 = vmatmul.msk.bf16.vlgmr.msra.gmra.mxu2 %vm701_vm10, %v1169_v1  ;;  %v843_v49 = vor.u32 %v883_v45, %v840_v47  ;;  %v847_v50 = vor.u32 %v887_v5, %v846_v48 }
 0x12d   :  { %796 = vmatpush.bf16.msrb.mxu1 %v851_v46 }
 0x12e   :  { %770 = vmatpush.bf16.msra.mxu3 %v843_v49  ;;  %783 = vmatpush.bf16.msrb.mxu0 %v847_v50 }
 0x130   :  { %881 = vmatmul.msk.bf16.vlgmr.msrb.gmra.mxu1 %vm701_vm10, %v1169_v1 }
 0x131   :  { %879 = vmatmul.msk.bf16.vlgmr.msra.gmra.mxu3 %vm701_vm10, %v1169_v1  ;;  %880 = vmatmul.msk.bf16.vlgmr.msrb.gmra.mxu0 %vm701_vm10, %v1169_v1 }
 0x139   :  { %v624_v51 = vpop.permute.xlu2 %623 }
 0x169   :  { %v733_v53 = vpop.f32.mrf.mxu0  ;;  %v746_v54 = vpop.f32.mrf.mxu1 }
 0x16a   :  { %v734_v52 = vadd.f32 %v733_v53, %v624_v51  ;;  %v747_v55 = vadd.f32 %v746_v54, %v624_v51 }
 0x16c   :  { %802 = vst [vmem:[#allocation6] sm:$0xff] %v734_v52 }
 0x16d   :  { %803 = vst [vmem:[#allocation6 + $0x8] sm:$0xff] %v747_v55 }
 0x171   :  { %v735_v56 = vpop.f32.mrf.mxu0  ;;  %v748_v57 = vpop.f32.mrf.mxu1 }
 0x1ad   :  { %v798_v58 = vpop.f32.mrf.mxu1 }
 0x1ae   :  { %v799_v59 = vadd.f32 %v798_v58, %v624_v51  ;;  %v785_v60 = vpop.f32.mrf.mxu0 }
 0x1af   :  { %v786_v61 = vadd.f32 %v785_v60, %v624_v51  ;;  %v759_v62 = vpop.f32.mrf.mxu2 }
 0x1b0   :  { %808 = vst [vmem:[#allocation6 + $0x28] sm:$0xff] %v799_v59  ;;  %v760_v2 = vadd.f32 %v759_v62, %v624_v51 }
 0x1b1   :  { %807 = vst [vmem:[#allocation6 + $0x20] sm:$0xff] %v786_v61 }
 0x1b2   :  { %804 = vst [vmem:[#allocation6 + $0x10] sm:$0xff] %v760_v2 }
 0x1b4   :  { %v772_v1 = vpop.f32.mrf.mxu3 }
 0x1b5   :  { %v773_v6 = vadd.f32 %v772_v1, %v624_v51  ;;  %v800_v7 = vpop.f32.mrf.mxu1 }
 0x1b6   :  { %v787_v8 = vpop.f32.mrf.mxu0 }
 0x1b7   :  { %806 = vst [vmem:[#allocation6 + $0x18] sm:$0xff] %v773_v6  ;;  %v761_v9 = vpop.f32.mrf.mxu2 }
 0x1b8   :  { %821 = dma.vmem_to_hbm [thread:$0]  %s814_s29, 768, %s816_s5, [#allocation5], %s976_s6, %s976_s6, %s977_s7  }
 0x1bc   :  { %v774_v10 = vpop.f32.mrf.mxu3 }
 0x1bd   :  { %961 = dma.done.wait [#allocation5], 768  }
 0x1be   :  { %962 = vsyncadd [#allocation5], 4294966528 }
 0x1bf   :  { %826 = vsyncpa [#allocation4], 1 }
 0x1c0   :  { %827 = vsyncpa [#allocation5], 1 }

</bundles_post_ra>
